<compile_context>
chip_gen: v5e
topology: v5e:2x2
jax: 0.10.0
libtpu: 0.0.40
codegen_flags: <defaults>
</compile_context>

<pallas_src>
import functools

import jax
import jax.numpy as jnp
import numpy as np
from jax.experimental import pallas as pl
from jax.experimental.pallas import tpu as pltpu

DEFAULT_ALPHA = 1.0
DEFAULT_BETA = 1.0

_VMEM_LIMIT = 32 * 1024 * 1024   # fits under v5e/v6e (128 MiB) and v7x (64 MiB) physical VMEM


def _pick_tile(dim, candidates):
    """Largest candidate that divides `dim`, else the full dim (toy shapes)."""
    for c in candidates:
        if dim % c == 0:
            return c
    return dim


# ----------------------------------------------------------------------------
# Kernel 1: linear editor   directions = [entity ; attribute] @ W^T + b
#   Tiled over (N = H tiles, K = 2H tiles); W stays in native layout/dtype and
#   is streamed tile-by-tile (double-buffered) from HBM.
# ----------------------------------------------------------------------------
def editor_kernel(x_ref, w_ref, b_ref, o_ref, acc_ref):
    # x_ref: (B, tk)   w_ref: (tn, tk) [native nn.Linear layout]   b_ref: (1, tn)
    # o_ref: (B, tn)   acc_ref: (B, tn) f32
    k = pl.program_id(1)

    @pl.when(k == 0)
    def _init():
        acc_ref[...] = jnp.zeros_like(acc_ref)

    # Contract x's last dim against W's last dim (== x @ W.T) without
    # materializing a transposed/upcast copy of the weight in the wrapper.
    acc_ref[...] += jax.lax.dot_general(
        x_ref[...], w_ref[...],
        dimension_numbers=(((1,), (1,)), ((), ())),
        preferred_element_type=jnp.float32)

    @pl.when(k == pl.num_programs(1) - 1)
    def _finalize():
        o_ref[...] = (acc_ref[...] + b_ref[...].astype(jnp.float32)).astype(o_ref.dtype)


def editor_forward(entity, attribute, weight, bias, *, tn=None, tk=None):
    """REMEDI LinearEditor: nn.Linear(2H, H) applied to concat(entity, attribute)."""
    x = jnp.concatenate([entity, attribute], axis=-1)      # (B, 2H)  -- glue
    B, K = x.shape
    H = weight.shape[0]
    assert weight.shape == (H, K) and bias.shape == (H,)
    if tn is None:
        tn = _pick_tile(H, (512, 256, 128))
    if tk is None:
        tk = _pick_tile(K, (1024, 512, 256, 128))
    grid = (H // tn, K // tk)

    return pl.pallas_call(
        editor_kernel,
        out_shape=jax.ShapeDtypeStruct((B, H), entity.dtype),
        grid_spec=pltpu.PrefetchScalarGridSpec(
            num_scalar_prefetch=0,
            grid=grid,
            in_specs=[
                pl.BlockSpec((B, tk), lambda n, k: (0, k)),    # x tile
                pl.BlockSpec((tn, tk), lambda n, k: (n, k)),   # weight tile (native dtype/layout)
                pl.BlockSpec((1, tn), lambda n, k: (0, n)),    # bias tile
            ],
            out_specs=pl.BlockSpec((B, tn), lambda n, k: (0, n)),
            scratch_shapes=[pltpu.VMEM((B, tn), jnp.float32)],
        ),
        compiler_params=pltpu.CompilerParams(
            dimension_semantics=("parallel", "arbitrary"),
            vmem_limit_bytes=_VMEM_LIMIT),
    )(x, weight, bias.reshape(1, H))


# ----------------------------------------------------------------------------
# Kernel 2: apply_direction hook (in-place on an aliased output)
#   out[b, s] = beta*h[b, s] + alpha*d[b]  if token_range[b,0] <= s < token_range[b,1]
#             = h[b, s]                    otherwise (untouched tiles preserved via alias)
# ----------------------------------------------------------------------------
def apply_direction_kernel(tr_ref, h_ref, d_ref, o_ref, *,
                           alpha, beta, ts, n_s_blocks):
    bi = pl.program_id(0)
    st = pl.program_id(1)
    i = tr_ref[bi, 0]
    j = tr_ref[bi, 1]
    base = i // ts
    blk = jnp.minimum(base + st, n_s_blocks - 1)
    unclamped = (base + st) <= (n_s_blocks - 1)
    tile_lo = blk * ts

    h = h_ref[0]                                   # (TS, H)
    overlaps = unclamped & (i < tile_lo + ts) & (j > tile_lo)

    @pl.when(overlaps)
    def _edit():
        d = d_ref[0]                               # (1, H) -> broadcasts over TS
        pos = tile_lo + jax.lax.broadcasted_iota(jnp.int32, (ts, 1), 0)
        mask = (pos >= i) & (pos < j)              # (TS, 1) -> broadcasts over lanes
        # Keep math in the hiddens dtype (bf16 stays bf16 on v6e/v7x).
        # TODO(synk): on v5e (no bf16 VPU) upcast h/d to f32 here instead.
        edited = h * jnp.asarray(beta, h.dtype) + d * jnp.asarray(alpha, h.dtype)
        o_ref[0] = jnp.where(mask, edited, h)

    # Pass visited-but-unedited tiles straight through.  A "clamped" step
    # (base + st past the last block) revisits the previous step's block whose
    # output buffer is still resident with valid (possibly edited) data, so it
    # must NOT rewrite it -- except at st == 0, where the buffer is fresh.
    @pl.when(jnp.logical_not(overlaps) & (unclamped | (st == 0)))
    def _passthrough():
        o_ref[0] = h


def apply_direction_pallas(hiddens, directions, token_ranges,
                           alpha=DEFAULT_ALPHA, beta=DEFAULT_BETA,
                           *, ts=None, max_edit_len=None):
    """In-place REMEDI edit. `max_edit_len` (static) bounds the edit-window length
    so the grid only covers ceil(max_edit_len/ts)+1 sequence tiles per batch item
    starting at the tile containing token_range[b, 0]; all other tiles keep their
    input values through the input/output alias and never move through VMEM."""
    B, S, H = hiddens.shape
    if S == 1:
        # Matches the hook's `if output[0].shape[1] == 1: return output` skip.
        return hiddens
    if ts is None:
        ts = _pick_tile(S, (256, 128, 64, 32, 16, 8))
    assert S % ts == 0
    n_s_blocks = S // ts
    if max_edit_len is None:
        n_edit_tiles = n_s_blocks
    else:
        n_edit_tiles = max(1, min(n_s_blocks, pl.cdiv(int(max_edit_len), ts) + 1))

    d3 = directions.astype(hiddens.dtype).reshape(B, 1, H)       # glue reshape
    token_ranges = token_ranges.astype(jnp.int32)

    def h_index_map(bi, st, tr):
        blk = jnp.minimum(tr[bi, 0] // ts + st, n_s_blocks - 1)
        return (bi, blk, 0)

    kernel = functools.partial(apply_direction_kernel, alpha=alpha, beta=beta,
                               ts=ts, n_s_blocks=n_s_blocks)
    return pl.pallas_call(
        kernel,
        out_shape=jax.ShapeDtypeStruct((B, S, H), hiddens.dtype),
        grid_spec=pltpu.PrefetchScalarGridSpec(
            num_scalar_prefetch=1,                   # token_ranges -> SMEM
            grid=(B, n_edit_tiles),
            in_specs=[
                pl.BlockSpec((1, ts, H), h_index_map),
                pl.BlockSpec((1, 1, H), lambda bi, st, tr: (bi, 0, 0)),
            ],
            out_specs=pl.BlockSpec((1, ts, H), h_index_map),
        ),
        # In-place edit: operand 1 (hiddens; operand 0 is the prefetched ranges)
        # aliases output 0, so untouched tiles keep their input values.
        input_output_aliases={1: 0},
        compiler_params=pltpu.CompilerParams(
            dimension_semantics=("parallel", "arbitrary"),
            vmem_limit_bytes=_VMEM_LIMIT),
    )(token_ranges, hiddens, d3)


# ----------------------------------------------------------------------------
# "EditedModel.forward" numeric core: compute directions, then edit hiddens.
# TODO(synk): running the wrapped HF language model / tokenizer / generate()
#             (nethook tracing, editor-input precompute) is framework glue with
#             no Pallas equivalent; only the edit math is implemented here.
# ----------------------------------------------------------------------------
def edited_model_forward(hiddens, entity_hiddens, attr_hiddens, token_ranges,
                         editor_weight, editor_bias,
                         alpha=DEFAULT_ALPHA, beta=DEFAULT_BETA,
                         *, seq_tile=None, max_edit_len=None):
    directions = editor_forward(entity_hiddens, attr_hiddens,
                                editor_weight, editor_bias)
    edited = apply_direction_pallas(hiddens, directions, token_ranges,
                                    alpha=alpha, beta=beta,
                                    ts=seq_tile, max_edit_len=max_edit_len)
    return directions, edited


if __name__ == "__main__":
    B, S, H = 2, 32, 32
    key = jax.random.PRNGKey(0)
    k1, k2, k3, k4, k5 = jax.random.split(key, 5)

    hiddens = jax.random.normal(k1, (B, S, H), dtype=jnp.float32)      # layer-L hiddens of the LM
    entity = jax.random.normal(k2, (B, H), dtype=jnp.float32)          # entity.entity.hiddens.L.*
    attribute = jax.random.normal(k3, (B, H), dtype=jnp.float32)       # context.attribute.hiddens.L.average
    editor_weight = jax.random.normal(k4, (H, 2 * H), dtype=jnp.float32) * 0.05  # nn.Linear(2H, H).weight
    editor_bias = jax.random.normal(k5, (H,), dtype=jnp.float32) * 0.05          # nn.Linear(2H, H).bias
    # One window inside a single seq tile, one crossing a tile boundary.
    token_ranges = jnp.array([[1, 4], [14, 21]], dtype=jnp.int32)      # prompt.entity.token_range

    # Snapshot inputs for the reference before the aliased (in-place) kernel runs.
    hiddens_np = np.asarray(hiddens)
    entity_np, attr_np = np.asarray(entity), np.asarray(attribute)
    w_np, b_np = np.asarray(editor_weight), np.asarray(editor_bias)
    tr_np = np.asarray(token_ranges)

    directions, edited = edited_model_forward(
        hiddens, entity, attribute, token_ranges, editor_weight, editor_bias,
        alpha=DEFAULT_ALPHA, beta=DEFAULT_BETA,
        seq_tile=8, max_edit_len=int((tr_np[:, 1] - tr_np[:, 0]).max()))
    jax.block_until_ready(edited)

    # Reference (plain numpy) check.
    x = np.concatenate([entity_np, attr_np], axis=-1)
    dir_ref = x @ w_np.T + b_np
    edited_ref = hiddens_np.copy()
    for bi, (i, j) in enumerate(tr_np.tolist()):
        edited_ref[bi, i:j] = (DEFAULT_BETA * edited_ref[bi, i:j]
                               + DEFAULT_ALPHA * dir_ref[bi])
    np.testing.assert_allclose(np.asarray(directions), dir_ref, rtol=1e-5, atol=1e-5)
    np.testing.assert_allclose(np.asarray(edited), edited_ref, rtol=1e-5, atol=1e-5)

    print("KERNEL_OK")
</pallas_src>

<mosaic_0001>
module attributes {stable_mosaic.version = 11 : i64} {
  func.func @editor_kernel(%arg0: i32, %arg1: i32, %arg2: memref<2x64xf32, #tpu.memory_space<vmem>>, %arg3: memref<32x64xf32, #tpu.memory_space<vmem>>, %arg4: memref<1x32xf32, #tpu.memory_space<vmem>>, %arg5: memref<2x32xf32, #tpu.memory_space<vmem>>, %arg6: memref<2x32xf32, #tpu.memory_space<vmem>>) attributes {dimension_semantics = [#tpu.dimension_semantics<parallel>, #tpu.dimension_semantics<arbitrary>], iteration_bounds = array<i64: 1, 1>, scalar_prefetch = 0 : i64, scratch_operands = 1 : i64, tpu.core_type = #tpu.core_type<tc>, window_params = [{transform_indices = @transform_0, window_bounds = array<i64: 2, 64>}, {transform_indices = @transform_1, window_bounds = array<i64: 32, 64>}, {transform_indices = @transform_2, window_bounds = array<i64: 1, 32>}, {transform_indices = @transform_3, window_bounds = array<i64: 2, 32>}]} {
    %c0_i32 = arith.constant 0 : i32
    %0 = arith.cmpi eq, %arg1, %c0_i32 : i32
    %1 = arith.extui %0 : i1 to i32
    %c0_i32_0 = arith.constant 0 : i32
    %2 = arith.cmpi ne, %1, %c0_i32_0 : i32
    scf.if %2 {
      %cst_10 = arith.constant 0.000000e+00 : f32
      %12 = vector.broadcast %cst_10 : f32 to vector<2x32xf32>
      %c0_11 = arith.constant 0 : index
      %c0_12 = arith.constant 0 : index
      %13 = vector.load %arg6[%c0_11, %c0_12] : memref<2x32xf32, #tpu.memory_space<vmem>>, vector<2x32xf32>
      tpu.vector_store %arg6[%c0_11, %c0_12], %12 {strides = array<i32>} : memref<2x32xf32, #tpu.memory_space<vmem>>, vector<2x32xf32>,
    } else {
    }
    %c0 = arith.constant 0 : index
    %c0_1 = arith.constant 0 : index
    %3 = vector.load %arg6[%c0, %c0_1] : memref<2x32xf32, #tpu.memory_space<vmem>>, vector<2x32xf32>
    %c0_2 = arith.constant 0 : index
    %c0_3 = arith.constant 0 : index
    %4 = vector.load %arg2[%c0_2, %c0_3] : memref<2x64xf32, #tpu.memory_space<vmem>>, vector<2x64xf32>
    %c0_4 = arith.constant 0 : index
    %c0_5 = arith.constant 0 : index
    %5 = vector.load %arg3[%c0_4, %c0_5] : memref<32x64xf32, #tpu.memory_space<vmem>>, vector<32x64xf32>
    %cst = arith.constant dense<0.000000e+00> : vector<2x32xf32>
    %6 = tpu.matmul %4, %5, %cst {dimension_numbers = #tpu.dot_dimension_numbers<[1], [1], [0], [0], [0, 0, 1, 0], [], []>} : vector<2x64xf32>, vector<32x64xf32>, vector<2x32xf32> -> vector<2x32xf32>
    %7 = arith.addf %3, %6 : vector<2x32xf32>
    %c0_6 = arith.constant 0 : index
    %c0_7 = arith.constant 0 : index
    %8 = vector.load %arg6[%c0_6, %c0_7] : memref<2x32xf32, #tpu.memory_space<vmem>>, vector<2x32xf32>
    tpu.vector_store %arg6[%c0_6, %c0_7], %7 {strides = array<i32>} : memref<2x32xf32, #tpu.memory_space<vmem>>, vector<2x32xf32>,
    %c0_i32_8 = arith.constant 0 : i32
    %9 = arith.cmpi eq, %arg1, %c0_i32_8 : i32
    %10 = arith.extui %9 : i1 to i32
    %c0_i32_9 = arith.constant 0 : i32
    %11 = arith.cmpi ne, %10, %c0_i32_9 : i32
    scf.if %11 {
      %c0_10 = arith.constant 0 : index
      %c0_11 = arith.constant 0 : index
      %12 = vector.load %arg6[%c0_10, %c0_11] : memref<2x32xf32, #tpu.memory_space<vmem>>, vector<2x32xf32>
      %c0_12 = arith.constant 0 : index
      %c0_13 = arith.constant 0 : index
      %13 = vector.load %arg4[%c0_12, %c0_13] : memref<1x32xf32, #tpu.memory_space<vmem>>, vector<1x32xf32>
      %14 = vector.broadcast %13 : vector<1x32xf32> to vector<2x32xf32>
      %15 = arith.addf %12, %14 : vector<2x32xf32>
      %c0_14 = arith.constant 0 : index
      %c0_15 = arith.constant 0 : index
      %16 = vector.load %arg5[%c0_14, %c0_15] : memref<2x32xf32, #tpu.memory_space<vmem>>, vector<2x32xf32>
      tpu.vector_store %arg5[%c0_14, %c0_15], %15 {strides = array<i32>} : memref<2x32xf32, #tpu.memory_space<vmem>>, vector<2x32xf32>,
    } else {
    }
    return
  }
  func.func @transform_0(%arg0: i32, %arg1: i32) -> (i32, i32) {
    %c0_i32 = arith.constant 0 : i32
    %c0_i32_0 = arith.constant 0 : i32
    return %c0_i32, %arg1 : i32, i32
  }
  func.func @transform_1(%arg0: i32, %arg1: i32) -> (i32, i32) {
    %c0_i32 = arith.constant 0 : i32
    return %arg0, %arg1 : i32, i32
  }
  func.func @transform_2(%arg0: i32, %arg1: i32) -> (i32, i32) {
    %c0_i32 = arith.constant 0 : i32
    %c0_i32_0 = arith.constant 0 : i32
    return %c0_i32, %arg0 : i32, i32
  }
  func.func @transform_3(%arg0: i32, %arg1: i32) -> (i32, i32) {
    %c0_i32 = arith.constant 0 : i32
    %c0_i32_0 = arith.constant 0 : i32
    return %c0_i32, %arg0 : i32, i32
  }
}

</mosaic_0001>

<bundles_post_ra>
// kernel: tpu_custom_call.1
= control target key start
LH: loop header
LB: loop body
LE: loop exit
PB: predicated region body
PF: predicated region fallthrough
CT: control target
= control target key end

     0   :  { %8 = vsyncpa [#allocation4], 0  ;;  %s255_s0 = inlined_call_operand.hbm [shape: f32[2,64], index: 0, kind: input, shape index: {}]   ;;  %s256_s1 = inlined_call_operand.hbm [shape: f32[32,64], index: 1, kind: input, shape index: {}]   ;;  %s257_s2 = inlined_call_operand.vmem [shape: f32[1,32], index: 2, kind: input, shape index: {}]   ;;  %s258_s3 = inlined_call_operand.hbm [shape: f32[2,32], index: 3, kind: output, shape index: {}]  }
   0x1   :  { %9 = vsyncpa [#allocation7], 0 }
   0x2   :  { %10 = vsyncpa [#allocation5], 0  ;;  %s16_s14 = sshll.u32 %s255_s0, 4  ;;  %s214_s15 = smov [#allocation3]   ;;  %s17_s14 = int_to_ptr.hbm [resolvable:$true] %s16_s14 }
   0x3   :  { %s18_s16 = sshll.u32 %s214_s15, 4  ;;  %s26_s19 = sshll.u32 %s256_s1, 4  ;;  %s19_s16 = int_to_ptr.vmem [resolvable:$true] %s18_s16  ;;  %s27_s19 = int_to_ptr.hbm [resolvable:$true] %s26_s19 }
   0x4   :  { %21 = dma.hbm_to_vmem [thread:$0]  %s17_s14, 32, %s19_s16, [#allocation4]  }
   0x5   :  { %s215_s20 = smov [#allocation6]   ;;  %s216_s22 = smov 128  }
   0x6   :  { %s28_s21 = sshll.u32 %s215_s20, 4  ;;  %s217_s23 = smov 8   ;;  %s29_s21 = int_to_ptr.vmem [resolvable:$true] %s28_s21 }
   0x7   :  { %34 = dma.hbm_to_vmem [thread:$0]  %s27_s19, 512, %s29_s21, [#allocation7], %s216_s22, %s216_s22, %s217_s23  }
   0x8   :  { %208 = dma.done.wait [#allocation4], 32  }
   0x9   :  { %209 = vsyncadd [#allocation4], 4294967264 }
   0xa   :  { %210 = dma.done.wait [#allocation7], 512  }
   0xb   :  { %211 = vsyncadd [#allocation7], 4294966784  ;;  %vm49_vm0 = vcmask 254976   ;;  %v218_v0 = vmov 0.0   ;;  %vm57_vm1 = vcmask 523264   ;;  %v56_v1 = vld [vmem:[#allocation6 + $0x18] sm:$0xff] }
   0xc   :  { %50 = vst.msk [vmem:[#allocation2] sm:$0x3] %vm49_vm0, %v218_v0  ;;  %124 = vmatpush.xpose.msk.msra.mxu0 %vm57_vm1, %v56_v1  ;;  %v55_v2 = vld [vmem:[#allocation6 + $0x10] sm:$0xff]  ;;  %v54_v3 = vld [vmem:[#allocation6 + $0x8] sm:$0xff]  ;;  %v53_v4 = vld [vmem:[#allocation6] sm:$0xff]  ;;  %s219_s24 = smov [#allocation8]  }
   0xd   :  { %v52_v5 = vld [vmem:[#allocation3] sm:$0x3]  ;;  %v135_v9 = vld [vmem:[%s257_s2] ss:$0 sm:$0xff]  ;;  %s111_s25 = sshll.u32 %s219_s24, 4  ;;  %s113_s28 = sshll.u32 %s258_s3, 4  ;;  %s112_s25 = int_to_ptr.vmem [resolvable:$true] %s111_s25  ;;  %s114_s28 = int_to_ptr.hbm [resolvable:$true] %s113_s28 }
  0x10   :  { %125 = vmatpush.xpose.msk.msra.mxu0 %vm57_vm1, %v55_v2 }
  0x13   :  { %v51_v6 = vld [vmem:[#allocation2] sm:$0x3] }
  0x14   :  { %126 = vmatpush.xpose.msk.msra.mxu0 %vm57_vm1, %v54_v3 }
  0x18   :  { %127 = vmatpush.xpose.msk.msra.mxu0 %vm57_vm1, %v53_v4 }
  0x1b   :  { %128 = vmatmul.msk.f32.vlgmr.msra.gmra.mxu0 %vm57_vm1, %v52_v5 }
  0x98   :  { %v90_v7 = vpop.f32.mrf.mxu0 }
  0x99   :  { %v93_v8 = vadd.f32 %v90_v7, %v51_v6 }
  0x9b   :  { %95 = vst.msk [vmem:[#allocation2] sm:$0x3] %vm49_vm0, %v93_v8 }
  0xa2   :  { %v99_v10 = vld [vmem:[#allocation2] sm:$0x3] }
  0xa3   :  { %v104_v11 = vadd.f32 %v135_v9, %v99_v10 }
  0xa5   :  { %105 = vst.msk [vmem:[#allocation8] sm:$0x3] %vm49_vm0, %v104_v11 }
  0xa6   :  { %116 = dma.vmem_to_hbm [thread:$0]  %s112_s25, 32, %s114_s28, [#allocation5]  }
  0xa7   :  { %212 = dma.done.wait [#allocation5], 32  }
  0xa8   :  { %213 = vsyncadd [#allocation5], 4294967264 }
  0xa9   :  { %121 = vsyncpa [#allocation4], 1 }
  0xaa   :  { %122 = vsyncpa [#allocation7], 1 }
  0xab   :  { %123 = vsyncpa [#allocation5], 1 }

</bundles_post_ra>
